<compile_context>
chip_gen: v7x
topology: tpu7x:2x2x1
jax: 0.10.0
libtpu: 0.0.40
codegen_flags: <defaults>
</compile_context>

<pallas_src>
import jax
import jax.numpy as jnp
from jax.experimental import pallas as pl
from jax.experimental.pallas import tpu as pltpu


def _round_up(n, m):
    return ((n + m - 1) // m) * m


def _mc_reinforce_kernel(x_ref, w1_ref, b1_ref, w2_ref, b2_ref, out_ref):
    """One batch tile of the policy MLP, natural [batch, feature] layout.

    Block shapes (all float32):
      x   : [TB, n_obs]
      w1  : [n_obs, hidden]      resident (fc1.weight transposed)
      b1  : [1, hidden]          resident
      w2  : [hidden, n_actions]  resident (fc3.weight transposed)
      b2  : [1, n_actions]       resident
      out : [TB, n_actions]

    NOTE (ragged last tile): rows beyond the true batch contain unspecified
    VMEM data. Every op below is per-row (the softmax reduces only over the
    action axis), and Pallas masks those rows on the output store, so garbage
    never escapes. Do not add cross-row reductions without re-adding padding.
    """
    x = x_ref[...]

    # fc1 + ReLU  -> [TB, hidden]
    h = jnp.dot(x, w1_ref[...], preferred_element_type=jnp.float32)
    h = jnp.maximum(h + b1_ref[...], 0.0)

    # fc3 + ReLU  -> [TB, n_actions]
    o = jnp.dot(h, w2_ref[...], preferred_element_type=jnp.float32)
    o = jnp.maximum(o + b2_ref[...], 0.0)

    # Numerically stable softmax over the action (last) axis, exact division
    # so rows sum to 1 (important if a consumer takes log-probs).
    m = jnp.max(o, axis=-1, keepdims=True)
    e = jnp.exp(o - m)
    probs = e / jnp.sum(e, axis=-1, keepdims=True)

    # torch.clamp(probs, min=1e-8, max=1.0): exact division already gives
    # probs <= 1.0, so only the lower clamp is needed.
    out_ref[...] = jnp.maximum(probs, 1e-8).astype(out_ref.dtype)


def mc_reinforce_forward(x, w1, b1, w2, b2, *, block_b=2048):
    """Forward pass of MC_REINFORCE_network via Pallas.

    x  : [B, n_obs]            float32
    w1 : [hidden, n_obs]       float32  (fc1.weight, PyTorch [out, in] layout)
    b1 : [hidden]              float32  (fc1.bias)
    w2 : [n_actions, hidden]   float32  (fc3.weight)
    b2 : [n_actions]           float32  (fc3.bias)
    returns [B, n_actions] float32 action probabilities.
    """
    batch, n_obs = x.shape
    hidden = w1.shape[0]
    n_actions = w2.shape[0]

    SUB = 8  # f32 sublane granularity
    b_al = _round_up(batch, SUB)
    tb = min(_round_up(block_b, SUB), b_al)
    # v7x megacore: make sure the "parallel" batch axis has >= 2 grid steps
    # whenever the batch is big enough, so work shards across both TCs.
    if b_al >= 256:
        tb = min(tb, _round_up(pl.cdiv(b_al, 2), SUB))
    grid = (pl.cdiv(batch, tb),)

    # Only the tiny (<= hidden x n_obs) parameters are touched in the wrapper;
    # x goes into the kernel untouched (no pad / transpose / cast HBM passes).
    w1_t = w1.T.astype(jnp.float32)                 # [n_obs, hidden]
    w2_t = w2.T.astype(jnp.float32)                 # [hidden, n_actions]
    b1_r = b1.reshape(1, hidden).astype(jnp.float32)
    b2_r = b2.reshape(1, n_actions).astype(jnp.float32)

    return pl.pallas_call(
        _mc_reinforce_kernel,
        out_shape=jax.ShapeDtypeStruct((batch, n_actions), jnp.float32),
        grid=grid,
        in_specs=[
            pl.BlockSpec((tb, n_obs), lambda i: (i, 0)),           # x tile
            pl.BlockSpec((n_obs, hidden), lambda i: (0, 0)),       # w1 resident
            pl.BlockSpec((1, hidden), lambda i: (0, 0)),           # b1 resident
            pl.BlockSpec((hidden, n_actions), lambda i: (0, 0)),   # w2 resident
            pl.BlockSpec((1, n_actions), lambda i: (0, 0)),        # b2 resident
        ],
        out_specs=pl.BlockSpec((tb, n_actions), lambda i: (i, 0)),
        compiler_params=pltpu.CompilerParams(
            dimension_semantics=("parallel",),
        ),
    )(x, w1_t, b1_r, w2_t, b2_r)


def init_params(key, n_observations, hidden_size, n_actions):
    """Deterministic init mimicking nn.Linear default (uniform +/- 1/sqrt(fan_in)),
    stored in the natural PyTorch [out, in] layout."""
    k1, k2, k3, k4 = jax.random.split(key, 4)
    bound1 = 1.0 / jnp.sqrt(jnp.float32(n_observations))
    bound2 = 1.0 / jnp.sqrt(jnp.float32(hidden_size))
    w1 = jax.random.uniform(k1, (hidden_size, n_observations), jnp.float32,
                            -bound1, bound1)
    b1 = jax.random.uniform(k2, (hidden_size,), jnp.float32, -bound1, bound1)
    w2 = jax.random.uniform(k3, (n_actions, hidden_size), jnp.float32,
                            -bound2, bound2)
    b2 = jax.random.uniform(k4, (n_actions,), jnp.float32, -bound2, bound2)
    return w1, b1, w2, b2


def reference_forward(x, w1, b1, w2, b2):
    """Pure-JAX f32 reference (exact PyTorch semantics) for correctness check."""
    h = jnp.maximum(x @ w1.T + b1, 0.0)
    o = jnp.maximum(h @ w2.T + b2, 0.0)
    o = o - jnp.max(o, axis=-1, keepdims=True)
    e = jnp.exp(o)
    p = e / jnp.sum(e, axis=-1, keepdims=True)
    return jnp.clip(p, 1e-8, 1.0)


if __name__ == "__main__":
    # CartPole-like sizes implied by the module: 4 observations, 32 hidden, 2 actions.
    n_observations, hidden_size, n_actions = 4, 32, 2

    key = jax.random.PRNGKey(0)
    kx_small, kx_big, kp = jax.random.split(key, 3)
    w1, b1, w2, b2 = init_params(kp, n_observations, hidden_size, n_actions)

    # batch=8  : single grid step, tile == batch.
    # batch=300: multi-tile parallel grid (2 steps) + ragged (masked) last tile.
    for batch, kx in ((8, kx_small), (300, kx_big)):
        x = jax.random.normal(kx, (batch, n_observations), dtype=jnp.float32)
        out = jax.block_until_ready(mc_reinforce_forward(x, w1, b1, w2, b2))
        ref = reference_forward(x, w1, b1, w2, b2)

        assert out.shape == (batch, n_actions)
        assert jnp.allclose(out, ref, atol=5e-3, rtol=1e-3), "mismatch vs reference"
        # Valid clamped probabilities; exact division -> rows sum to 1.
        assert jnp.all(out >= 1e-8) and jnp.all(out <= 1.0)
        assert jnp.all(jnp.abs(jnp.sum(out, axis=-1) - 1.0) < 1e-5)

    print("KERNEL_OK")
</pallas_src>

<mosaic_0001>
module attributes {stable_mosaic.version = 11 : i64} {
  func.func @_mc_reinforce_kernel(%arg0: i32, %arg1: memref<8x4xf32, #tpu.memory_space<vmem>>, %arg2: memref<4x32xf32, #tpu.memory_space<vmem>>, %arg3: memref<1x32xf32, #tpu.memory_space<vmem>>, %arg4: memref<32x2xf32, #tpu.memory_space<vmem>>, %arg5: memref<1x2xf32, #tpu.memory_space<vmem>>, %arg6: memref<8x2xf32, #tpu.memory_space<vmem>>) attributes {dimension_semantics = [#tpu.dimension_semantics<parallel>], iteration_bounds = array<i64: 1>, scalar_prefetch = 0 : i64, scratch_operands = 0 : i64, tpu.core_type = #tpu.core_type<tc>, window_params = [{transform_indices = @transform_0, window_bounds = array<i64: 8, 4>}, {pipeline_mode = #tpu.pipeline_mode<synchronous>, transform_indices = @transform_1, window_bounds = array<i64: 4, 32>}, {pipeline_mode = #tpu.pipeline_mode<synchronous>, transform_indices = @transform_2, window_bounds = array<i64: 1, 32>}, {pipeline_mode = #tpu.pipeline_mode<synchronous>, transform_indices = @transform_3, window_bounds = array<i64: 32, 2>}, {pipeline_mode = #tpu.pipeline_mode<synchronous>, transform_indices = @transform_4, window_bounds = array<i64: 1, 2>}, {transform_indices = @transform_5, window_bounds = array<i64: 8, 2>}]} {
    %c0 = arith.constant 0 : index
    %c0_0 = arith.constant 0 : index
    %0 = vector.load %arg1[%c0, %c0_0] : memref<8x4xf32, #tpu.memory_space<vmem>>, vector<8x4xf32>
    %c0_1 = arith.constant 0 : index
    %c0_2 = arith.constant 0 : index
    %1 = vector.load %arg2[%c0_1, %c0_2] : memref<4x32xf32, #tpu.memory_space<vmem>>, vector<4x32xf32>
    %cst = arith.constant dense<0.000000e+00> : vector<8x32xf32>
    %2 = tpu.matmul %0, %1, %cst {dimension_numbers = #tpu.dot_dimension_numbers<[1], [0], [0], [1], [0, 0, 1, 1], [], []>} : vector<8x4xf32>, vector<4x32xf32>, vector<8x32xf32> -> vector<8x32xf32>
    %c0_3 = arith.constant 0 : index
    %c0_4 = arith.constant 0 : index
    %3 = vector.load %arg3[%c0_3, %c0_4] : memref<1x32xf32, #tpu.memory_space<vmem>>, vector<1x32xf32>
    %4 = vector.broadcast %3 : vector<1x32xf32> to vector<8x32xf32>
    %5 = arith.addf %2, %4 : vector<8x32xf32>
    %cst_5 = arith.constant 0.000000e+00 : f32
    %6 = vector.broadcast %cst_5 : f32 to vector<8x32xf32>
    %7 = arith.maximumf %5, %6 : vector<8x32xf32>
    %c0_6 = arith.constant 0 : index
    %c0_7 = arith.constant 0 : index
    %8 = vector.load %arg4[%c0_6, %c0_7] : memref<32x2xf32, #tpu.memory_space<vmem>>, vector<32x2xf32>
    %cst_8 = arith.constant dense<0.000000e+00> : vector<8x2xf32>
    %9 = tpu.matmul %7, %8, %cst_8 {dimension_numbers = #tpu.dot_dimension_numbers<[1], [0], [0], [1], [0, 0, 1, 1], [], []>} : vector<8x32xf32>, vector<32x2xf32>, vector<8x2xf32> -> vector<8x2xf32>
    %c0_9 = arith.constant 0 : index
    %c0_10 = arith.constant 0 : index
    %10 = vector.load %arg5[%c0_9, %c0_10] : memref<1x2xf32, #tpu.memory_space<vmem>>, vector<1x2xf32>
    %11 = vector.broadcast %10 : vector<1x2xf32> to vector<8x2xf32>
    %12 = arith.addf %9, %11 : vector<8x2xf32>
    %cst_11 = arith.constant 0.000000e+00 : f32
    %13 = vector.broadcast %cst_11 : f32 to vector<8x2xf32>
    %14 = arith.maximumf %12, %13 : vector<8x2xf32>
    %cst_12 = arith.constant dense<0xFF800000> : vector<8xf32>
    %15 = vector.multi_reduction <maximumf>, %14, %cst_12 [1] : vector<8x2xf32> to vector<8xf32>
    %16 = vector.shape_cast %15 : vector<8xf32> to vector<8x1xf32>
    %17 = vector.broadcast %16 : vector<8x1xf32> to vector<8x2xf32>
    %18 = arith.subf %14, %17 : vector<8x2xf32>
    %19 = math.exp %18 : vector<8x2xf32>
    %cst_13 = arith.constant dense<0.000000e+00> : vector<8xf32>
    %20 = vector.multi_reduction <add>, %19, %cst_13 [1] : vector<8x2xf32> to vector<8xf32>
    %21 = vector.shape_cast %20 : vector<8xf32> to vector<8x1xf32>
    %22 = vector.broadcast %21 : vector<8x1xf32> to vector<8x2xf32>
    %23 = arith.divf %19, %22 : vector<8x2xf32>
    %cst_14 = arith.constant 9.99999993E-9 : f32
    %24 = vector.broadcast %cst_14 : f32 to vector<8x2xf32>
    %25 = arith.maximumf %23, %24 : vector<8x2xf32>
    %c0_15 = arith.constant 0 : index
    %c0_16 = arith.constant 0 : index
    %26 = vector.load %arg6[%c0_15, %c0_16] : memref<8x2xf32, #tpu.memory_space<vmem>>, vector<8x2xf32>
    tpu.vector_store %arg6[%c0_15, %c0_16], %25 {strides = array<i32>} : memref<8x2xf32, #tpu.memory_space<vmem>>, vector<8x2xf32>,
    return
  }
  func.func @transform_0(%arg0: i32) -> (i32, i32) {
    %c0_i32 = arith.constant 0 : i32
    %c0_i32_0 = arith.constant 0 : i32
    return %arg0, %c0_i32 : i32, i32
  }
  func.func @transform_1(%arg0: i32) -> (i32, i32) {
    %c0_i32 = arith.constant 0 : i32
    %c0_i32_0 = arith.constant 0 : i32
    %c0_i32_1 = arith.constant 0 : i32
    return %c0_i32, %c0_i32_0 : i32, i32
  }
  func.func @transform_2(%arg0: i32) -> (i32, i32) {
    %c0_i32 = arith.constant 0 : i32
    %c0_i32_0 = arith.constant 0 : i32
    %c0_i32_1 = arith.constant 0 : i32
    return %c0_i32, %c0_i32_0 : i32, i32
  }
  func.func @transform_3(%arg0: i32) -> (i32, i32) {
    %c0_i32 = arith.constant 0 : i32
    %c0_i32_0 = arith.constant 0 : i32
    %c0_i32_1 = arith.constant 0 : i32
    return %c0_i32, %c0_i32_0 : i32, i32
  }
  func.func @transform_4(%arg0: i32) -> (i32, i32) {
    %c0_i32 = arith.constant 0 : i32
    %c0_i32_0 = arith.constant 0 : i32
    %c0_i32_1 = arith.constant 0 : i32
    return %c0_i32, %c0_i32_0 : i32, i32
  }
  func.func @transform_5(%arg0: i32) -> (i32, i32) {
    %c0_i32 = arith.constant 0 : i32
    %c0_i32_0 = arith.constant 0 : i32
    return %arg0, %c0_i32 : i32, i32
  }
}

</mosaic_0001>

<bundles_post_ra>
// kernel: tpu_custom_call.1
= control target key start
LH: loop header
LB: loop body
LE: loop exit
PB: predicated region body
PF: predicated region fallthrough
CT: control target
= control target key end

     0   :  { %vm33_vm0 = vcmask 1043456   ;;  %vm29_vm1 = vcmask 31744   ;;  %v253_v0 = vmov 0.0   ;;  %vm254_vm2 = vmmov 0   ;;  %s316_s1 = inlined_call_operand.vmem [shape: f32[4,32], index: 1, kind: input, shape index: {}]   ;;  %s317_s0 = inlined_call_operand.vmem [shape: f32[8,4], index: 0, kind: input, shape index: {}]   ;;  %s318_s3 = inlined_call_operand.vmem [shape: f32[32,2], index: 3, kind: input, shape index: {}]   ;;  %s319_s2 = inlined_call_operand.vmem [shape: f32[1,32], index: 2, kind: input, shape index: {}]   ;;  %s320_s4 = inlined_call_operand.vmem [shape: f32[1,2], index: 4, kind: input, shape index: {}]   ;;  %s321_s5 = inlined_call_operand.vmem [shape: f32[8,2], index: 5, kind: output, shape index: {}]  }
   0x1   :  { %224 = vmatprep.subr.mxu0 %v253_v0  ;;  %v21_v1 = vld [vmem:[%s316_s1] sm:$0xf]  ;;  %226 = vmatprep.mubr.msk.f32.mxu0 %vm254_vm2, %v253_v0  ;;  %v255_v4 = vmov 0.0|0.0   ;;  %v109_v5 = vld [vmem:[%s318_s3 + $0x8] sm:$0xff]  ;;  %v110_v7 = vld [vmem:[%s318_s3 + $0x10] sm:$0xff]  ;;  %vm119_vm3 = vcmask 261120  }
   0x2   :  { %v20_v2 = vld [vmem:[%s317_s0] sm:$0xff]  ;;  %225 = vmatpush3.msk.msra.mxu0 %vm33_vm0, %v21_v1  ;;  %240 = vmatprep.subr.bf16.mxu1 %v255_v4  ;;  %v111_v8 = vld [vmem:[%s318_s3 + $0x18] sm:$0xff]  ;;  %vm194_vm4 = vcmask 15360  }
   0x3   :  { %v108_v3 = vld [vmem:[%s318_s3] sm:$0xff]  ;;  %227 = vmatmul.mubr.msk.f32.vlgmr.msra.gmra.mrb[0].mxu0 %vm29_vm1, %v20_v2  ;;  %237 = vmatprep.mubr.msk.f32.mxu1 %vm254_vm2, %v253_v0  ;;  %v244_v9 = vpack.c.bf16 %v111_v8, %v110_v7 }
   0x4   :  { %v241_v6 = vpack.c.bf16 %v109_v5, %v108_v3  ;;  %v212_v10 = vld [vmem:[%s319_s2] ss:$0 sm:$0xff] }
   0x5   :  { %v215_v15 = vld [vmem:[%s320_s4] ss:$0 sm:$0xff] }
   0x6   :  { %242 = vmatpush3.bf16.msra.mxu1 %v241_v6 }
   0x7   :  { %243 = vmatprep.subr.bf16.mxu1 %v255_v4 }
   0xa   :  { %245 = vmatpush3.bf16.msra.mxu1 %v244_v9 }
  0xd6   :  { %v103_v11 = vpop.f32.mrb[0].mxu0 }
  0xd7   :  { %v104_v12 = vadd.f32 %v212_v10, %v103_v11  ;;  %v228_v13 = vpop.f32.mrb[1].mxu0 }
  0xd9   :  { %v107_v14 = vmax.f32 %v104_v12, 0.0 }
  0xdb   :  { %238 = vmatmul.mubr.msk.f32.vlgmr.msra.gmra.mrb[0].mxu1 %vm119_vm3, %v107_v14 }
 0x1ae   :  { %v189_v16 = vpop.f32.mrb[0].mxu1 }
 0x1af   :  { %v190_v17 = vadd.f32 %v215_v15, %v189_v16  ;;  %v239_v18 = vpop.f32.mrb[1].mxu1 }
 0x1b1   :  { %v193_v19 = vmax.f32 %v190_v17, 0.0 }
 0x1b3   :  { %v195_v20 = vsel %vm194_vm4, %v193_v19, -inf }
 0x1b4   :  { %196 = vmax.xlane.f32.xlu0 %v195_v20 }
 0x241   :  { %v197_v21 = vpop.xlane.xlu0 %196 }
 0x242   :  { %v198_v22 = vsub.f32 %v193_v19, %v197_v21 }
 0x244   :  { %v199_v23 = vmul.f32 1.442695, %v198_v22 }
 0x246   :  { %249 = vpow2.f32 %v199_v23 }
 0x250   :  { %v250_v24 = vpop.eup %249 }
 0x251   :  { %v201_v25 = vsel %vm194_vm4, %v250_v24, 0.0 }
 0x252   :  { %202 = vadd.xlane.f32.xlu0 %v201_v25 }
 0x2df   :  { %v203_v26 = vpop.xlane.xlu0 %202 }
 0x2e0   :  { %251 = vrcp.f32 %v203_v26 }
 0x2ea   :  { %v252_v27 = vpop.eup %251 }
 0x2eb   :  { %v205_v28 = vmul.f32 %v252_v27, %v250_v24 }
 0x2ed   :  { %v206_v29 = vmax.f32 %v205_v28, 1e-08 }
 0x2ef   :  { %207 = vst.msk [vmem:[%s321_s5] sm:$0xff] %vm194_vm4, %v206_v29 }

</bundles_post_ra>
